<compile_context>
chip_gen: v6e
topology: v6e:2x2x1
jax: 0.10.0
libtpu: 0.0.40
codegen_flags: <defaults>
</compile_context>

<pallas_src>
import jax
import jax.numpy as jnp
from jax.experimental import pallas as pl
from jax.experimental.pallas import tpu as pltpu


def _make_hbm_copy_kernel(row_splits):
    """Kernel factory: direct HBM->HBM DMA copy, chunked along the leading dim.

    `row_splits` is a static tuple of leading-dim offsets (len == n_chunks+1).
    The body issues all chunk DMAs, then waits for all of them.  No VMEM or
    vreg traffic anywhere.
    """
    n_chunks = len(row_splits) - 1

    if n_chunks == 1:
        def kernel(src_hbm, dst_hbm, sems):
            cp = pltpu.make_async_copy(src_hbm, dst_hbm, sems.at[0])
            cp.start()
            cp.wait()
        return kernel

    def kernel(src_hbm, dst_hbm, sems):
        copies = []
        for c in range(n_chunks):
            lo = row_splits[c]
            sz = row_splits[c + 1] - lo
            cp = pltpu.make_async_copy(
                src_hbm.at[pl.ds(lo, sz)],
                dst_hbm.at[pl.ds(lo, sz)],
                sems.at[c],
            )
            cp.start()
            copies.append(cp)
        for cp in copies:
            cp.wait()

    return kernel


def pallas_embedding_copy(embedding):
    """Materializing identity copy of `embedding` via direct HBM->HBM DMA."""
    if embedding.ndim == 0:
        # Scalar parameter: nothing to DMA; the identity is the value itself.
        return embedding

    leading = embedding.shape[0]
    itemsize = jnp.dtype(embedding.dtype).itemsize
    total_bytes = int(embedding.size) * itemsize

    # Up to 4 concurrent DMA chunks (>= ~4 MiB each) along the leading dim for
    # large tensors; a single whole-array DMA otherwise.
    target_chunk_bytes = 4 * 1024 * 1024
    n_chunks = int(max(1, min(4, leading, total_bytes // target_chunk_bytes)))

    base, rem = divmod(leading, n_chunks)
    row_splits = [0]
    for c in range(n_chunks):
        row_splits.append(row_splits[-1] + base + (1 if c < rem else 0))

    return pl.pallas_call(
        _make_hbm_copy_kernel(tuple(row_splits)),
        out_shape=jax.ShapeDtypeStruct(embedding.shape, embedding.dtype),
        in_specs=[pl.BlockSpec(memory_space=pl.ANY)],
        out_specs=pl.BlockSpec(memory_space=pl.ANY),
        scratch_shapes=[pltpu.SemaphoreType.DMA((n_chunks,))],
        cost_estimate=pl.CostEstimate(
            flops=0, transcendentals=0, bytes_accessed=2 * total_bytes),
    )(embedding)


def naive_embedding_forward(embedding, *, force_materialize=False):
    """Pallas mirror of NaiveEmbedding.forward(): returns `embedding`.

    By default this is a zero-copy return of the parameter (exactly what the
    PyTorch module does -- optimal, zero HBM traffic).  Set
    `force_materialize=True` to get a fresh buffer produced by the HBM->HBM
    DMA kernel.
    """
    if not force_materialize:
        return embedding
    return pallas_embedding_copy(embedding)


class NaiveEmbeddingPallas:
    """JAX/Pallas mirror of the PyTorch NaiveEmbedding module."""

    def __init__(self, embed_dims, key):
        # Deterministic stand-in for torch.randn(*embed_dims).
        self.embedding = jax.random.normal(key, tuple(embed_dims), dtype=jnp.float32)

    def forward(self, *args, **kwargs):
        # forward ignores all inputs and returns the embedding parameter
        # (zero-copy, same as the PyTorch module returning the nn.Parameter).
        return naive_embedding_forward(self.embedding)


if __name__ == "__main__":
    key = jax.random.PRNGKey(0)
    embed_dims = (32, 128)  # small synthetic shape

    module = NaiveEmbeddingPallas(embed_dims, key)

    # Dummy "inputs" (ignored by the module, like the PyTorch version).
    x = jax.random.normal(jax.random.PRNGKey(1), (2, 4, 16, 16), dtype=jnp.float32)

    # Module forward: zero-copy, mirrors PyTorch semantics exactly.
    out_fwd = module.forward(x)

    # Exercise the Pallas HBM->HBM DMA copy kernel once and block on it.
    out_kernel = jax.block_until_ready(pallas_embedding_copy(module.embedding))

    # Correctness: both paths must match the embedding exactly.
    assert out_fwd.shape == embed_dims and out_fwd.dtype == module.embedding.dtype
    assert out_kernel.shape == embed_dims and out_kernel.dtype == module.embedding.dtype
    assert bool(jnp.array_equal(out_fwd, module.embedding))
    assert bool(jnp.array_equal(out_kernel, module.embedding))

    print("KERNEL_OK")
</pallas_src>

<mosaic_0001>
module attributes {stable_mosaic.version = 11 : i64} {
  func.func @kernel(%arg0: memref<32x128xf32, #tpu.memory_space<any>>, %arg1: memref<32x128xf32, #tpu.memory_space<any>>, %arg2: memref<1x!tpu.dma_semaphore, #tpu.memory_space<semaphore_mem>>) attributes {dimension_semantics = [], scalar_prefetch = 0 : i64, scratch_operands = 1 : i64, tpu.core_type = #tpu.core_type<tc>} {
    %c0_i32 = arith.constant 0 : i32
    %0 = tpu.memref_slice %arg2[%c0_i32] : memref<1x!tpu.dma_semaphore, #tpu.memory_space<semaphore_mem>> -> memref<1x!tpu.dma_semaphore, #tpu.memory_space<semaphore_mem>>
    %1 = tpu.memref_squeeze %0 : memref<1x!tpu.dma_semaphore, #tpu.memory_space<semaphore_mem>> -> memref<!tpu.dma_semaphore, #tpu.memory_space<semaphore_mem>>
    tpu.enqueue_dma source(%arg0 : memref<32x128xf32, #tpu.memory_space<any>>) target(%arg1 : memref<32x128xf32, #tpu.memory_space<any>>) target_semaphore(%1 : memref<!tpu.dma_semaphore, #tpu.memory_space<semaphore_mem>>)
    %c0_i32_0 = arith.constant 0 : i32
    %2 = tpu.memref_slice %arg2[%c0_i32_0] : memref<1x!tpu.dma_semaphore, #tpu.memory_space<semaphore_mem>> -> memref<1x!tpu.dma_semaphore, #tpu.memory_space<semaphore_mem>>
    %3 = tpu.memref_squeeze %2 : memref<1x!tpu.dma_semaphore, #tpu.memory_space<semaphore_mem>> -> memref<!tpu.dma_semaphore, #tpu.memory_space<semaphore_mem>>
    tpu.wait_dma2 semaphore(%3 : memref<!tpu.dma_semaphore, #tpu.memory_space<semaphore_mem>>) src(%arg0 : memref<32x128xf32, #tpu.memory_space<any>>) dst(%arg1 : memref<32x128xf32, #tpu.memory_space<any>>)
    return
  }
}

</mosaic_0001>

<bundles_post_ra>
// kernel: tpu_custom_call.1
= control target key start
LH: loop header
LB: loop body
LE: loop exit
PB: predicated region body
PF: predicated region fallthrough
CT: control target
= control target key end

     0   :  { %s28_s6 = smov [#allocation2]   ;;  %s29_s7 = smov 131072   ;;  %s47_s0 = inlined_call_operand.hbm [shape: f32[32,128], index: 0, kind: input, shape index: {}]   ;;  %s48_s1 = inlined_call_operand.hbm [shape: f32[32,128], index: 1, kind: output, shape index: {}]  }
   0x1   :  { %s30_s8 = smov 0  }
   0x2   :  { %12 = dma.general %s47_s0, 512, %s48_s1, %s28_s6, %s29_s7, [#allocation4], %s30_s8, 0  }
   0x3   :  { %26 = dma.done.wait [#allocation2], 512 }
   0x4   :  { %27 = vsyncadd [#allocation2], 4294966784 }
   0x5   :  { %16 = vsyncmov [#allocation2] }
   0x8   :  { %s17_s13 = vpop.sfrf %16 }
   0x9   :  { %p22_p0 = scmp.ne.s32.totalorder %s17_s13, 0 }
   0xb   :  { %21 = shalt.err (%p22_p0)  }

</bundles_post_ra>
